<compile_context>
chip_gen: v5e
topology: v5e:2x2
jax: 0.10.0
libtpu: 0.0.40
codegen_flags: <defaults>
</compile_context>

<pallas_src>
import functools

import jax
import jax.numpy as jnp
from jax.experimental import pallas as pl
from jax.experimental.pallas import tpu as pltpu


def _lab_kernel(x_ref, w_ref, m_ref, o_ref, *, h, w, include_ste):
    """One grid step over `tr` flattened (n, c) planes of length h*w each.

    x_ref: (tr, hw)   input rows (row = one (n, c) plane, row-major flattened)
    w_ref: (tr, 16)   per-row fused taps: cols 0..8 = dw (w1 - w0) for the 3x3
                      taps (tap t = 3*(di+1) + (dj+1)), col 9 = db (b1 - b0),
                      cols 10..15 = pad
    m_ref: (4, hw)    factored edge-validity masks [r>=1, r<=h-2, c>=1, c<=w-2]
    o_ref: (tr, hw)   output rows
    """
    hw = h * w
    x = x_ref[...]
    wb = w_ref[...]
    m = m_ref[...]

    rm_m = m[0:1, :]   # valid to read the row above    (di = -1)
    rm_p = m[1:2, :]   # valid to read the row below    (di = +1)
    cm_m = m[2:3, :]   # valid to read the column left  (dj = -1)
    cm_p = m[3:4, :]   # valid to read the column right (dj = +1)

    # Row-shifted, row-masked bases: base_di[i] = x[i + di*w] (0 outside image).
    # Wherever a lane roll below crosses a row boundary, the column mask zeroes
    # the value, so applying the row mask before the lane roll is exact.
    xu = pltpu.roll(x, shift=(hw - w) % hw, axis=1) * rm_p   # di = +1
    xd = pltpu.roll(x, shift=w % hw, axis=1) * rm_m          # di = -1

    def dwt(di, dj):
        t = 3 * (di + 1) + (dj + 1)
        return wb[:, t:t + 1]            # (tr, 1): lane-broadcast column

    # Group the 9 taps by column offset dj -> one lane roll + one column mask
    # per group; the per-row dw factors commute with the lane roll.
    s_c = dwt(-1, 0) * xd + dwt(0, 0) * x + dwt(1, 0) * xu        # dj =  0
    s_m = dwt(-1, -1) * xd + dwt(0, -1) * x + dwt(1, -1) * xu     # dj = -1
    s_p = dwt(-1, 1) * xd + dwt(0, 1) * x + dwt(1, 1) * xu        # dj = +1

    d = s_c
    d = d + cm_m * pltpu.roll(s_m, shift=1, axis=1)               # patch[i] = base[i-1]
    d = d + cm_p * pltpu.roll(s_p, shift=hw - 1, axis=1)          # patch[i] = base[i+1]
    d = d + wb[:, 9:10]                                           # + (b1 - b0)

    # argmax over the 2-way axis -> {-1, +1}; first index wins on exact ties.
    x_wo = jnp.where(d > 0, jnp.float32(1.0), jnp.float32(-1.0))
    if include_ste:
        # softmax(temperature*[x0,x1])[...,1]*2 - 1 == tanh((x1-x0)/2)  (T = 1.0)
        x_with = jnp.tanh(jnp.float32(0.5) * d)
        o_ref[...] = (x_wo - x_with) + x_with
    else:
        # Forward value of (x_wo - x_with).detach() + x_with equals x_wo (~1 ulp).
        # TODO(synk): no custom_vjp/backward kernel is defined, so gradients do
        # not flow through this pallas_call; a backward pass is needed to train.
        o_ref[...] = x_wo


def _edge_masks(h, w):
    """(4, hw) f32 factored validity masks: [r>=1, r<=h-2, c>=1, c<=w-2]."""
    idx = jnp.arange(h * w, dtype=jnp.int32)
    r = idx // w
    c = idx % w
    return jnp.stack([r >= 1, r <= h - 2, c >= 1, c <= w - 2],
                     axis=0).astype(jnp.float32)


def _pick_block_rows(total_rows, hw, target_bytes, min_steps=4):
    """Rows per grid step: multiple of 8 near the VMEM target, keeping at least
    `min_steps` grid steps when possible (so v7x's two TensorCores both get work
    and the pipeline has something to overlap)."""
    if total_rows <= 8:
        return total_rows                     # full leading dim -> legal block
    tr = max(8, target_bytes // (hw * 4))
    if total_rows >= 8 * min_steps:
        tr = min(tr, total_rows // min_steps)
    tr = max(8, (tr // 8) * 8)
    tr = min(tr, (total_rows // 8) * 8)
    return tr


def lab_forward(x, weight, bias, *, include_ste_arithmetic=False,
                target_block_bytes=2 << 20):
    """LAB forward pass.

    x:      (N, C, H, W) float32
    weight: (2C, 1, 3, 3) float32  (PyTorch depthwise Conv2d weight layout)
    bias:   (2C,) float32
    returns (N, C, H, W) float32
    """
    n, c, h, w = x.shape
    hw = h * w
    rows = n * c

    x2 = x.reshape(rows, hw).astype(jnp.float32)   # free row-major merge

    # Fuse the two depthwise filters: only x1 - x0 is ever used downstream.
    w_r = weight.reshape(c, 2, 9).astype(jnp.float32)
    b_r = bias.reshape(c, 2).astype(jnp.float32)
    dw = w_r[:, 1, :] - w_r[:, 0, :]                        # (c, 9)
    db = (b_r[:, 1] - b_r[:, 0])[:, None]                   # (c, 1)
    wpack_c = jnp.concatenate(
        [dw, db, jnp.zeros((c, 6), jnp.float32)], axis=1)   # (c, 16) lane-dense
    wpack = jnp.broadcast_to(wpack_c[None], (n, c, 16)).reshape(rows, 16)

    masks = _edge_masks(h, w)                                # (4, hw), resident

    tr = _pick_block_rows(rows, hw, target_block_bytes)
    grid = (pl.cdiv(rows, tr),)                 # ragged last block: per-row op,
                                                # OOB reads unused, OOB writes dropped

    kernel = functools.partial(_lab_kernel, h=h, w=w,
                               include_ste=include_ste_arithmetic)
    out = pl.pallas_call(
        kernel,
        out_shape=jax.ShapeDtypeStruct((rows, hw), jnp.float32),
        grid_spec=pltpu.PrefetchScalarGridSpec(
            num_scalar_prefetch=0,
            grid=grid,
            in_specs=[
                pl.BlockSpec((tr, hw), lambda i: (i, 0)),
                pl.BlockSpec((tr, 16), lambda i: (i, 0)),
                pl.BlockSpec((4, hw), lambda i: (0, 0)),   # constant -> fetched once
            ],
            out_specs=pl.BlockSpec((tr, hw), lambda i: (i, 0)),
        ),
        compiler_params=pltpu.CompilerParams(
            dimension_semantics=("parallel",),
            vmem_limit_bytes=32 * 1024 * 1024,
        ),
    )(x2, wpack, masks)
    return out.reshape(n, c, h, w)


def _lab_reference(x, weight, bias):
    """Faithful pure-JAX reference of the PyTorch forward (for self-check).

    Returns (output, x1 - x0) so the self-test can exclude exact decision-boundary
    ties where the sign is numerically ill-conditioned.
    """
    n, c, h, w = x.shape
    xp = jnp.pad(x, ((0, 0), (0, 0), (1, 1), (1, 1)))
    w_r = weight.reshape(c, 2, 3, 3)
    b_r = bias.reshape(c, 2)
    acc = jnp.zeros((n, c, 2, h, w), jnp.float32)
    for ki in range(3):
        for kj in range(3):
            patch = xp[:, :, ki:ki + h, kj:kj + w]               # (n, c, h, w)
            acc = acc + w_r[None, :, :, ki, kj, None, None] * patch[:, :, None]
    acc = acc + b_r[None, :, :, None, None]
    x0, x1 = acc[:, :, 0], acc[:, :, 1]
    x_wo = jnp.where(x1 > x0, 1.0, -1.0)
    m = jnp.maximum(x0, x1)
    p1 = jnp.exp(x1 - m) / (jnp.exp(x0 - m) + jnp.exp(x1 - m))
    x_with = p1 * 2.0 - 1.0
    return (x_wo - x_with) + x_with, x1 - x0


if __name__ == "__main__":
    key = jax.random.PRNGKey(0)
    k_x, k_w, k_b = jax.random.split(key, 3)

    N, C, H, W = 2, 4, 16, 16
    x = jax.random.normal(k_x, (N, C, H, W), dtype=jnp.float32)
    # Shapes from nn.Conv2d(C, 2C, kernel_size=3, padding=1, groups=C).
    weight = jax.random.normal(k_w, (2 * C, 1, 3, 3), dtype=jnp.float32) * 0.3
    bias = jax.random.normal(k_b, (2 * C,), dtype=jnp.float32) * 0.1

    out = jax.block_until_ready(lab_forward(x, weight, bias))
    out_ste = jax.block_until_ready(
        lab_forward(x, weight, bias, include_ste_arithmetic=True))
    ref, d_ref = _lab_reference(x, weight, bias)

    assert out.shape == (N, C, H, W)
    # Sign may legitimately differ from the reference only where the two conv
    # outputs are numerically tied (fused vs. separate accumulation rounding).
    near_tie = jnp.abs(d_ref) <= 1e-4
    assert bool(jnp.all(jnp.logical_or(jnp.abs(out - ref) <= 1e-4, near_tie)))
    assert bool(jnp.all(jnp.logical_or(jnp.abs(out_ste - ref) <= 1e-4, near_tie)))
    print("KERNEL_OK")
</pallas_src>

<mosaic_0001>
module attributes {stable_mosaic.version = 11 : i64} {
  func.func @_lab_kernel(%arg0: i32, %arg1: memref<8x256xf32, #tpu.memory_space<vmem>>, %arg2: memref<8x16xf32, #tpu.memory_space<vmem>>, %arg3: memref<4x256xf32, #tpu.memory_space<vmem>>, %arg4: memref<8x256xf32, #tpu.memory_space<vmem>>) attributes {dimension_semantics = [#tpu.dimension_semantics<parallel>], iteration_bounds = array<i64: 1>, scalar_prefetch = 0 : i64, scratch_operands = 0 : i64, tpu.core_type = #tpu.core_type<tc>, window_params = [{transform_indices = @transform_0, window_bounds = array<i64: 8, 256>}, {transform_indices = @transform_1, window_bounds = array<i64: 8, 16>}, {pipeline_mode = #tpu.pipeline_mode<synchronous>, transform_indices = @transform_2, window_bounds = array<i64: 4, 256>}, {transform_indices = @transform_3, window_bounds = array<i64: 8, 256>}]} {
    %c0 = arith.constant 0 : index
    %c0_0 = arith.constant 0 : index
    %0 = vector.load %arg1[%c0, %c0_0] : memref<8x256xf32, #tpu.memory_space<vmem>>, vector<8x256xf32>
    %c0_1 = arith.constant 0 : index
    %c0_2 = arith.constant 0 : index
    %1 = vector.load %arg2[%c0_1, %c0_2] : memref<8x16xf32, #tpu.memory_space<vmem>>, vector<8x16xf32>
    %c0_3 = arith.constant 0 : index
    %c0_4 = arith.constant 0 : index
    %2 = vector.load %arg3[%c0_3, %c0_4] : memref<4x256xf32, #tpu.memory_space<vmem>>, vector<4x256xf32>
    %3 = vector.extract_strided_slice %2 {offsets = [0, 0], sizes = [1, 256], strides = [1, 1]} : vector<4x256xf32> to vector<1x256xf32>
    %4 = vector.extract_strided_slice %2 {offsets = [1, 0], sizes = [1, 256], strides = [1, 1]} : vector<4x256xf32> to vector<1x256xf32>
    %5 = vector.extract_strided_slice %2 {offsets = [2, 0], sizes = [1, 256], strides = [1, 1]} : vector<4x256xf32> to vector<1x256xf32>
    %6 = vector.extract_strided_slice %2 {offsets = [3, 0], sizes = [1, 256], strides = [1, 1]} : vector<4x256xf32> to vector<1x256xf32>
    %c240_i32 = arith.constant 240 : i32
    %7 = tpu.dynamic_rotate %0 by %c240_i32 dim 1 : vector<8x256xf32>, i32 -> vector<8x256xf32>
    %8 = vector.broadcast %4 : vector<1x256xf32> to vector<8x256xf32>
    %9 = arith.mulf %7, %8 : vector<8x256xf32>
    %c16_i32 = arith.constant 16 : i32
    %10 = tpu.dynamic_rotate %0 by %c16_i32 dim 1 : vector<8x256xf32>, i32 -> vector<8x256xf32>
    %11 = vector.broadcast %3 : vector<1x256xf32> to vector<8x256xf32>
    %12 = arith.mulf %10, %11 : vector<8x256xf32>
    %13 = vector.extract_strided_slice %1 {offsets = [0, 1], sizes = [8, 1], strides = [1, 1]} : vector<8x16xf32> to vector<8x1xf32>
    %14 = vector.broadcast %13 : vector<8x1xf32> to vector<8x256xf32>
    %15 = arith.mulf %14, %12 : vector<8x256xf32>
    %16 = vector.extract_strided_slice %1 {offsets = [0, 4], sizes = [8, 1], strides = [1, 1]} : vector<8x16xf32> to vector<8x1xf32>
    %17 = vector.broadcast %16 : vector<8x1xf32> to vector<8x256xf32>
    %18 = arith.mulf %17, %0 : vector<8x256xf32>
    %19 = arith.addf %15, %18 : vector<8x256xf32>
    %20 = vector.extract_strided_slice %1 {offsets = [0, 7], sizes = [8, 1], strides = [1, 1]} : vector<8x16xf32> to vector<8x1xf32>
    %21 = vector.broadcast %20 : vector<8x1xf32> to vector<8x256xf32>
    %22 = arith.mulf %21, %9 : vector<8x256xf32>
    %23 = arith.addf %19, %22 : vector<8x256xf32>
    %24 = vector.extract_strided_slice %1 {offsets = [0, 0], sizes = [8, 1], strides = [1, 1]} : vector<8x16xf32> to vector<8x1xf32>
    %25 = vector.broadcast %24 : vector<8x1xf32> to vector<8x256xf32>
    %26 = arith.mulf %25, %12 : vector<8x256xf32>
    %27 = vector.extract_strided_slice %1 {offsets = [0, 3], sizes = [8, 1], strides = [1, 1]} : vector<8x16xf32> to vector<8x1xf32>
    %28 = vector.broadcast %27 : vector<8x1xf32> to vector<8x256xf32>
    %29 = arith.mulf %28, %0 : vector<8x256xf32>
    %30 = arith.addf %26, %29 : vector<8x256xf32>
    %31 = vector.extract_strided_slice %1 {offsets = [0, 6], sizes = [8, 1], strides = [1, 1]} : vector<8x16xf32> to vector<8x1xf32>
    %32 = vector.broadcast %31 : vector<8x1xf32> to vector<8x256xf32>
    %33 = arith.mulf %32, %9 : vector<8x256xf32>
    %34 = arith.addf %30, %33 : vector<8x256xf32>
    %35 = vector.extract_strided_slice %1 {offsets = [0, 2], sizes = [8, 1], strides = [1, 1]} : vector<8x16xf32> to vector<8x1xf32>
    %36 = vector.broadcast %35 : vector<8x1xf32> to vector<8x256xf32>
    %37 = arith.mulf %36, %12 : vector<8x256xf32>
    %38 = vector.extract_strided_slice %1 {offsets = [0, 5], sizes = [8, 1], strides = [1, 1]} : vector<8x16xf32> to vector<8x1xf32>
    %39 = vector.broadcast %38 : vector<8x1xf32> to vector<8x256xf32>
    %40 = arith.mulf %39, %0 : vector<8x256xf32>
    %41 = arith.addf %37, %40 : vector<8x256xf32>
    %42 = vector.extract_strided_slice %1 {offsets = [0, 8], sizes = [8, 1], strides = [1, 1]} : vector<8x16xf32> to vector<8x1xf32>
    %43 = vector.broadcast %42 : vector<8x1xf32> to vector<8x256xf32>
    %44 = arith.mulf %43, %9 : vector<8x256xf32>
    %45 = arith.addf %41, %44 : vector<8x256xf32>
    %c1_i32 = arith.constant 1 : i32
    %46 = tpu.dynamic_rotate %34 by %c1_i32 dim 1 : vector<8x256xf32>, i32 -> vector<8x256xf32>
    %47 = vector.broadcast %5 : vector<1x256xf32> to vector<8x256xf32>
    %48 = arith.mulf %47, %46 : vector<8x256xf32>
    %49 = arith.addf %23, %48 : vector<8x256xf32>
    %c255_i32 = arith.constant 255 : i32
    %50 = tpu.dynamic_rotate %45 by %c255_i32 dim 1 : vector<8x256xf32>, i32 -> vector<8x256xf32>
    %51 = vector.broadcast %6 : vector<1x256xf32> to vector<8x256xf32>
    %52 = arith.mulf %51, %50 : vector<8x256xf32>
    %53 = arith.addf %49, %52 : vector<8x256xf32>
    %54 = vector.extract_strided_slice %1 {offsets = [0, 9], sizes = [8, 1], strides = [1, 1]} : vector<8x16xf32> to vector<8x1xf32>
    %55 = vector.broadcast %54 : vector<8x1xf32> to vector<8x256xf32>
    %56 = arith.addf %53, %55 : vector<8x256xf32>
    %cst = arith.constant 0.000000e+00 : f32
    %57 = vector.broadcast %cst : f32 to vector<8x256xf32>
    %58 = arith.cmpf ogt, %56, %57 : vector<8x256xf32>
    %cst_5 = arith.constant 1.000000e+00 : f32
    %cst_6 = arith.constant -1.000000e+00 : f32
    %59 = vector.broadcast %cst_5 : f32 to vector<8x256xf32>
    %60 = vector.broadcast %cst_6 : f32 to vector<8x256xf32>
    %61 = arith.select %58, %59, %60 : vector<8x256xi1>, vector<8x256xf32>
    %c0_7 = arith.constant 0 : index
    %c0_8 = arith.constant 0 : index
    %62 = vector.load %arg4[%c0_7, %c0_8] : memref<8x256xf32, #tpu.memory_space<vmem>>, vector<8x256xf32>
    tpu.vector_store %arg4[%c0_7, %c0_8], %61 {strides = array<i32>} : memref<8x256xf32, #tpu.memory_space<vmem>>, vector<8x256xf32>,
    return
  }
  func.func @transform_0(%arg0: i32) -> (i32, i32) {
    %c0_i32 = arith.constant 0 : i32
    %c0_i32_0 = arith.constant 0 : i32
    return %arg0, %c0_i32 : i32, i32
  }
  func.func @transform_1(%arg0: i32) -> (i32, i32) {
    %c0_i32 = arith.constant 0 : i32
    %c0_i32_0 = arith.constant 0 : i32
    return %arg0, %c0_i32 : i32, i32
  }
  func.func @transform_2(%arg0: i32) -> (i32, i32) {
    %c0_i32 = arith.constant 0 : i32
    %c0_i32_0 = arith.constant 0 : i32
    %c0_i32_1 = arith.constant 0 : i32
    return %c0_i32, %c0_i32_0 : i32, i32
  }
  func.func @transform_3(%arg0: i32) -> (i32, i32) {
    %c0_i32 = arith.constant 0 : i32
    %c0_i32_0 = arith.constant 0 : i32
    return %arg0, %c0_i32 : i32, i32
  }
}

</mosaic_0001>

<bundles_post_ra>
// kernel: tpu_custom_call.1
= control target key start
LH: loop header
LB: loop body
LE: loop exit
PB: predicated region body
PF: predicated region fallthrough
CT: control target
= control target key end

     0   :  { %8 = vsyncpa [#allocation3], 0  ;;  %s449_s0 = inlined_call_operand.hbm [shape: f32[8,256], index: 0, kind: input, shape index: {}]   ;;  %s450_s1 = inlined_call_operand.hbm [shape: f32[8,16], index: 1, kind: input, shape index: {}]   ;;  %s451_s2 = inlined_call_operand.hbm [shape: f32[4,256], index: 2, kind: input, shape index: {}]   ;;  %s452_s3 = inlined_call_operand.hbm [shape: f32[8,256], index: 3, kind: output, shape index: {}]  }
   0x1   :  { %9 = vsyncpa [#allocation6], 0  ;;  %s27_s14 = sshll.u32 %s450_s1, 4  ;;  %s28_s14 = int_to_ptr.hbm [resolvable:$true] %s27_s14 }
   0x2   :  { %10 = vsyncpa [#allocation4], 0  ;;  %s356_s15 = smov [#allocation5]   ;;  %s16_s19 = sshll.u32 %s449_s0, 4  ;;  %s17_s19 = int_to_ptr.hbm [resolvable:$true] %s16_s19 }
   0x3   :  { %s29_s16 = sshll.u32 %s356_s15, 4  ;;  %s357_s20 = smov [#allocation2]   ;;  %s30_s16 = int_to_ptr.vmem [resolvable:$true] %s29_s16 }
   0x4   :  { %32 = dma.hbm_to_vmem [thread:$0]  %s28_s14, 128, %s30_s16, [#allocation6]  }
   0x5   :  { %s18_s21 = sshll.u32 %s357_s20, 4  ;;  %s38_s24 = sshll.u32 %s451_s2, 4  ;;  %s19_s21 = int_to_ptr.vmem [resolvable:$true] %s18_s21  ;;  %s39_s24 = int_to_ptr.hbm [resolvable:$true] %s38_s24 }
   0x6   :  { %21 = dma.hbm_to_vmem [thread:$0]  %s17_s19, 256, %s19_s21, [#allocation3]  }
   0x7   :  { %s358_s1 = smov [#allocation7]  }
   0x8   :  { %s40_s25 = sshll.u32 %s358_s1, 4  ;;  %s41_s25 = int_to_ptr.vmem [resolvable:$true] %s40_s25 }
   0x9   :  { %43 = dma.hbm_to_vmem [thread:$0]  %s39_s24, 128, %s41_s25, [#allocation6]  }
   0xa   :  { %350 = dma.done.wait [#allocation3], 256  }
   0xb   :  { %351 = vsyncadd [#allocation3], 4294967040 }
   0xc   :  { %352 = dma.done.wait [#allocation6], 256  }
   0xd   :  { %353 = vsyncadd [#allocation6], 4294967040  ;;  %v359_v0 = vmov 0   ;;  %v360_v1 = vmov 2   ;;  %v361_v2 = vmov 6   ;;  %v404_v3 = vld [vmem:[#allocation2] sm:$0xff]  ;;  %v64_v12 = vlaneseq }
   0xe   :  { %243 = vset.pattern.permute.xlu2 %v359_v0  ;;  %246 = vset.pattern.permute.xlu1 %v360_v1  ;;  %v406_v4 = vld [vmem:[#allocation5] sm:$0xff]  ;;  %s362_s0 = smov 112   ;;  %s363_s2 = smov 16   ;;  %v411_v5 = vld [vmem:[#allocation2 + $0x8] sm:$0xff]  ;;  %v364_v6 = vmov 3   ;;  %v365_v7 = vmov 5  }
   0xf   :  { %245 = vset.pattern.permute.xlu0 %v361_v2  ;;  %60 = vrot.lane.b32.xlu1 %v404_v3, %s362_s0  ;;  %v366_v8 = vmov 8   ;;  %v367_v9 = vmov 4   ;;  %v368_v10 = vmov 1   ;;  %v369_v11 = vmov 7   ;;  %v423_v14 = vld [vmem:[#allocation7] sm:$0xff]  ;;  %s371_s26 = smov 1  }
  0x10   :  { %78 = vrot.lane.b32.xlu0 %v404_v3, %s363_s2  ;;  %117 = vperm.xlu2 %243, %v406_v4   ;;  %v370_v15 = vmov 9   ;;  %v425_v18 = vand.u32 127, %v64_v12  ;;  %v85_v19 = vperm.slane %v423_v14, 0  ;;  %v86_v20 = vperm.slane %v423_v14, 4  ;;  %s372_s27 = smov 127   ;;  %s373_s28 = smov [#allocation8]  }
  0x11   :  { %v70_v23 = vperm.slane %v423_v14, 1  ;;  %v71_v24 = vperm.slane %v423_v14, 5  ;;  %s211_s29 = sshll.u32 %s373_s28, 4  ;;  %s213_s5 = sshll.u32 %s452_s3, 4  ;;  %s212_s29 = int_to_ptr.vmem [resolvable:$true] %s211_s29  ;;  %s214_s5 = int_to_ptr.hbm [resolvable:$true] %s213_s5 }
  0x12   :  { %vm82_vm0 = vcmp.lt.s32.totalorder %v425_v18, 16  ;;  %v89_v21 = vperm.slane %v85_v19, 0  ;;  %v90_v22 = vperm.slane %v86_v20, 0  ;;  %vm66_vm1 = vcmp.lt.s32.totalorder %v425_v18, 112 }
  0x13   :  { %v74_v32 = vperm.slane %v70_v23, 1  ;;  %v75_v33 = vperm.slane %v71_v24, 1  ;;  %vm164_vm2 = vcmp.lt.s32.totalorder %v425_v18, 1  ;;  %v185_v20 = vperm.slane %v423_v14, 7 }
  0x14   :  { %vm181_vm3 = vcmp.lt.s32.totalorder %v425_v18, 127  ;;  %v374_v18 = vmov -1.0  }
  0x17   :  { %62 = vrot.lane.b32.xlu1 %v411_v5, %s362_s0 }
  0x18   :  { %80 = vrot.lane.b32.xlu0 %v411_v5, %s363_s2  ;;  %244 = vset.pattern.permute.xlu2 %v364_v6 }
  0x19   :  { %123 = vperm.xlu2 %244, %v406_v4  }
  0x1f   :  { %139 = vperm.xlu1 %246, %v406_v4  }
  0x20   :  { %131 = vperm.xlu0 %245, %v406_v4  }
  0x21   :  { %247 = vset.pattern.permute.xlu2 %v365_v7 }
  0x22   :  { %145 = vperm.xlu2 %247, %v406_v4  }
  0x27   :  { %248 = vset.pattern.permute.xlu1 %v366_v8 }
  0x28   :  { %250 = vset.pattern.permute.xlu0 %v367_v9  ;;  %153 = vperm.xlu1 %248, %v406_v4  }
  0x29   :  { %101 = vperm.xlu0 %250, %v406_v4  }
  0x2a   :  { %249 = vset.pattern.permute.xlu2 %v368_v10 }
  0x2b   :  { %95 = vperm.xlu2 %249, %v406_v4  }
  0x30   :  { %251 = vset.pattern.permute.xlu1 %v369_v11 }
  0x31   :  { %109 = vperm.xlu1 %251, %v406_v4   ;;  %253 = vset.pattern.permute.xlu0 %v370_v15 }
  0x39   :  { %252 = vset.pattern.permute.xlu1 %v370_v15 }
  0x6a   :  { %v118_v13 = vpop.permute.xlu2 %117 }
  0x73   :  { %v124_v29 = vpop.permute.xlu2 %123 }
  0x74   :  { %v126_v36 = vmul.f32 %v124_v29, %v404_v3  ;;  %v127_v37 = vmul.f32 %v124_v29, %v411_v5 }
  0x7c   :  { %v146_v50 = vpop.permute.xlu2 %145 }
  0x7d   :  { %v148_v51 = vmul.f32 %v146_v50, %v404_v3  ;;  %v149_v52 = vmul.f32 %v146_v50, %v411_v5 }
  0x81   :  { %v61_v16 = vpop.permute.xlu1 %60 }
  0x82   :  { %v79_v17 = vpop.permute.xlu0 %78 }
  0x85   :  { %v96_v63 = vpop.permute.xlu2 %95 }
  0x89   :  { %v63_v25 = vpop.permute.xlu1 %62 }
  0x8a   :  { %v81_v26 = vpop.permute.xlu0 %80  ;;  %v67_v34 = vsel %vm66_vm1, %v61_v16, %v63_v25  ;;  %v68_v35 = vsel %vm66_vm1, %v63_v25, %v61_v16  ;;  %v168_v16 = vperm.slane %v423_v14, 6 }
  0x8b   :  { %v83_v27 = vsel %vm82_vm0, %v79_v17, %v81_v26  ;;  %v84_v28 = vsel %vm82_vm0, %v81_v26, %v79_v17  ;;  %v76_v40 = vmul.f32 %v74_v32, %v67_v34  ;;  %v77_v41 = vmul.f32 %v75_v33, %v68_v35 }
  0x8c   :  { %v91_v30 = vmul.f32 %v89_v21, %v84_v28  ;;  %v92_v31 = vmul.f32 %v90_v22, %v83_v27  ;;  %v172_v19 = vperm.slane %v168_v16, 2  ;;  %v189_v26 = vperm.slane %v185_v20, 3 }
  0x8e   :  { %v120_v38 = vmul.f32 %v118_v13, %v91_v30  ;;  %v121_v39 = vmul.f32 %v118_v13, %v92_v31  ;;  %v98_v2 = vmul.f32 %v96_v63, %v91_v30  ;;  %v99_v6 = vmul.f32 %v96_v63, %v92_v31 }
  0x90   :  { %v129_v44 = vadd.f32 %v127_v37, %v121_v39  ;;  %v128_v45 = vadd.f32 %v126_v36, %v120_v38 }
  0x91   :  { %v140_v42 = vpop.permute.xlu1 %139 }
  0x92   :  { %v132_v43 = vpop.permute.xlu0 %131  ;;  %v142_v53 = vmul.f32 %v140_v42, %v91_v30  ;;  %v143_v54 = vmul.f32 %v140_v42, %v92_v31 }
  0x93   :  { %v134_v46 = vmul.f32 %v132_v43, %v76_v40  ;;  %v135_v47 = vmul.f32 %v132_v43, %v77_v41 }
  0x94   :  { %v150_v56 = vadd.f32 %v148_v51, %v142_v53  ;;  %v151_v57 = vadd.f32 %v149_v52, %v143_v54 }
  0x95   :  { %v136_v48 = vadd.f32 %v134_v46, %v128_v45  ;;  %v137_v49 = vadd.f32 %v135_v47, %v129_v44 }
  0x97   :  { %162 = vrot.lane.b32.xlu1 %v137_v49, %s371_s26  ;;  %160 = vrot.lane.b32.xlu2 %v136_v48, %s371_s26 }
  0x9a   :  { %v154_v55 = vpop.permute.xlu1 %153 }
  0x9b   :  { %v156_v58 = vmul.f32 %v154_v55, %v76_v40  ;;  %v157_v59 = vmul.f32 %v154_v55, %v77_v41  ;;  %v102_v62 = vpop.permute.xlu0 %101 }
  0x9c   :  { %v104_v0 = vmul.f32 %v102_v62, %v404_v3  ;;  %v105_v1 = vmul.f32 %v102_v62, %v411_v5  ;;  %v184_v5 = vperm.slane %v423_v14, 3 }
  0x9d   :  { %v158_v60 = vadd.f32 %v156_v58, %v150_v56  ;;  %v159_v61 = vadd.f32 %v157_v59, %v151_v57 }
  0x9e   :  { %v106_v8 = vadd.f32 %v104_v0, %v98_v2  ;;  %v107_v9 = vadd.f32 %v105_v1, %v99_v6  ;;  %v188_v25 = vperm.slane %v184_v5, 3 }
  0x9f   :  { %195 = vperm.xlu1 %252, %v406_v4   ;;  %179 = vrot.lane.b32.xlu0 %v159_v61, %s372_s27  ;;  %v167_v4 = vperm.slane %v423_v14, 2 }
  0xa0   :  { %177 = vrot.lane.b32.xlu2 %v158_v60, %s372_s27 }
  0xa1   :  { %v171_v3 = vperm.slane %v167_v4, 2 }
  0xa3   :  { %v110_v7 = vpop.permute.xlu1 %109 }
  0xa4   :  { %v112_v10 = vmul.f32 %v110_v7, %v76_v40  ;;  %v113_v11 = vmul.f32 %v110_v7, %v77_v41 }
  0xa6   :  { %v114_v12 = vadd.f32 %v112_v10, %v106_v8  ;;  %v115_v13 = vadd.f32 %v113_v11, %v107_v9 }
  0xf1   :  { %v161_v15 = vpop.permute.xlu2 %160 }
  0xfa   :  { %v178_v27 = vpop.permute.xlu2 %177 }
 0x109   :  { %v163_v17 = vpop.permute.xlu1 %162 }
 0x10a   :  { %v165_v21 = vsel %vm164_vm2, %v161_v15, %v163_v17  ;;  %v166_v22 = vsel %vm164_vm2, %v163_v17, %v161_v15 }
 0x10b   :  { %v173_v23 = vmul.f32 %v171_v3, %v166_v22  ;;  %v174_v24 = vmul.f32 %v172_v19, %v165_v21 }
 0x10d   :  { %v175_v33 = vadd.f32 %v173_v23, %v114_v12  ;;  %v176_v34 = vadd.f32 %v174_v24, %v115_v13 }
 0x111   :  { %v180_v28 = vpop.permute.xlu0 %179  ;;  %v196_v35 = vpop.permute.xlu1 %195 }
 0x112   :  { %v182_v29 = vsel %vm181_vm3, %v178_v27, %v180_v28  ;;  %v183_v30 = vsel %vm181_vm3, %v180_v28, %v178_v27 }
 0x113   :  { %v190_v31 = vmul.f32 %v188_v25, %v182_v29  ;;  %v191_v32 = vmul.f32 %v189_v26, %v183_v30 }
 0x115   :  { %v192_v36 = vadd.f32 %v190_v31, %v175_v33  ;;  %v193_v37 = vadd.f32 %v191_v32, %v176_v34 }
 0x117   :  { %v198_v14 = vadd.f32 %v196_v35, %v192_v36  ;;  %v199_v38 = vadd.f32 %v196_v35, %v193_v37 }
 0x119   :  { %vm200_vm4 = vcmp.gt.f32.partialorder %v198_v14, 0.0  ;;  %vm201_vm5 = vcmp.gt.f32.partialorder %v199_v38, 0.0 }
 0x11a   :  { %v202_v39 = vsel %vm200_vm4, 1.0, %v374_v18  ;;  %v203_v40 = vsel %vm201_vm5, 1.0, %v374_v18 }
 0x11b   :  { %204 = vst [vmem:[#allocation8] sm:$0xff] %v202_v39 }
 0x11c   :  { %205 = vst [vmem:[#allocation8 + $0x8] sm:$0xff] %v203_v40 }
 0x11d   :  { %216 = dma.vmem_to_hbm [thread:$0]  %s212_s29, 256, %s214_s5, [#allocation4]  }
 0x11e   :  { %354 = dma.done.wait [#allocation4], 256  }
 0x11f   :  { %355 = vsyncadd [#allocation4], 4294967040 }
 0x120   :  { %221 = vsyncpa [#allocation3], 1 }
 0x121   :  { %222 = vsyncpa [#allocation6], 1 }
 0x122   :  { %223 = vsyncpa [#allocation4], 1 }

</bundles_post_ra>
